<compile_context>
chip_gen: v7x
topology: tpu7x:2x2x1
jax: 0.10.0
libtpu: 0.0.40
codegen_flags: <defaults>
</compile_context>

<pallas_src>
import functools

import jax
import jax.numpy as jnp
from jax.experimental import pallas as pl
from jax.experimental.pallas import tpu as pltpu


_LANE = 128                 # TPU vreg lane width
_SUBLANE = 8                # TPU vreg sublane count (32-bit)
_MAX_ROW_TILE = 1024        # HBM-roofline knee is ~512-1024 rows/step


def _round_up(n, m):
    return ((n + m - 1) // m) * m


def _hw_params():
    """Generation-aware knobs: (tile_budget_bytes, vmem_cap_bytes, min_grid_steps)."""
    try:
        vmem_cap = int(pltpu.get_tpu_info().vmem_capacity_bytes)
    except Exception:
        vmem_cap = 64 * 1024 * 1024          # conservative (v7x-like) fallback
    if vmem_cap >= 96 * 1024 * 1024:
        # v5e / v6e: 128 MiB VMEM, single TensorCore per chip -> big tiles and
        # no reason to keep extra (serial) grid steps around.
        return 64 * 1024 * 1024, 100 * 1024 * 1024, 1
    # v7x: 64 MiB VMEM per TensorCore, 2 TCs (megacore) -> tighter tile budget,
    # keep >= 4 grid steps so the "parallel" axis can be sharded across cores.
    return 32 * 1024 * 1024, 48 * 1024 * 1024, 4


def _pick_row_tile(n_rows, row_bytes, n_tiled, sub, tile_budget, min_steps):
    """Largest sublane-aligned row tile whose double-buffered working set fits
    the VMEM budget, capped at the HBM-roofline knee and (on v7x only) leaving
    a few grid steps for megacore load balancing."""
    fit = tile_budget // max(1, 2 * n_tiled * row_bytes)
    tr = max(sub, (fit // sub) * sub)
    tr = min(tr, _MAX_ROW_TILE)
    tr = min(tr, max(sub, _round_up(pl.cdiv(n_rows, min_steps), sub)))
    if tr >= n_rows:
        return n_rows          # one full-extent block (always a legal block dim)
    return tr                  # multiple of `sub`; Pallas masks the ragged tail


def _recip(x):
    # EUP approximate reciprocal + one Newton-Raphson step back to ~f32 accuracy
    # (keeps the divide off the VPU's VALU slot).
    r = pl.reciprocal(x, approx=True)
    return r * (2.0 - x * r)


def _seg_sum(v, seg):
    """Segment-sum along the lane axis via the (otherwise idle) MXU.

    v is split into a bf16-exact high part plus a small residual so the result
    keeps ~f32 accuracy even if the f32 matmul is lowered via bf16 MXU passes.
    TODO(synk): drop the hi/lo split (saves ~6 VPU ops/element; v7x-relevant)
    once full-precision f32 Mosaic matmul is guaranteed on every target.
    """
    hi = v.astype(jnp.bfloat16).astype(jnp.float32)
    lo = v - hi
    return (jnp.dot(hi, seg, preferred_element_type=jnp.float32)
            + jnp.dot(lo, seg, preferred_element_type=jnp.float32))


def _ln_math(x, a, b, *, eps, features, seg=None):
    """LayerNorm math on a (TR, L) f32 tile.

    seg is None   -> L == features, plain per-row reduction.
    seg is (L, L) -> L == k*features; each physical row packs k logical rows
                     along the lane axis; seg is the block-diagonal 0/1 matrix.
    """
    inv_nm1 = (1.0 / (features - 1)) if features > 1 else float("nan")
    if seg is None:
        mean = jnp.mean(x, axis=-1, keepdims=True)
        d = x - mean
        ssq = jnp.sum(d * d, axis=-1, keepdims=True)
    else:
        mean = _seg_sum(x, seg) * (1.0 / features)
        d = x - mean
        ssq = _seg_sum(d * d, seg)
    std = jnp.sqrt(ssq * inv_nm1)
    return (a * _recip(std + eps)) * d + b


def _ln_kernel(x_ref, a_ref, b_ref, o_ref, *, eps, features):
    out = _ln_math(x_ref[...].astype(jnp.float32), a_ref[...], b_ref[...],
                   eps=eps, features=features)
    o_ref[...] = out.astype(o_ref.dtype)


def _ln_kernel_folded(x_ref, a_ref, b_ref, seg_ref, o_ref, *, eps, features):
    out = _ln_math(x_ref[...].astype(jnp.float32), a_ref[...], b_ref[...],
                   eps=eps, features=features, seg=seg_ref[...])
    o_ref[...] = out.astype(o_ref.dtype)


def _add_ln_kernel(x_ref, r_ref, a_ref, b_ref, y_ref, o_ref, *, eps, features):
    y = x_ref[...].astype(jnp.float32) + r_ref[...].astype(jnp.float32)
    y_ref[...] = y.astype(y_ref.dtype)
    out = _ln_math(y, a_ref[...], b_ref[...], eps=eps, features=features)
    o_ref[...] = out.astype(o_ref.dtype)


def _add_ln_kernel_folded(x_ref, r_ref, a_ref, b_ref, seg_ref, y_ref, o_ref, *,
                          eps, features):
    y = x_ref[...].astype(jnp.float32) + r_ref[...].astype(jnp.float32)
    y_ref[...] = y.astype(y_ref.dtype)
    out = _ln_math(y, a_ref[...], b_ref[...], eps=eps, features=features,
                   seg=seg_ref[...])
    o_ref[...] = out.astype(o_ref.dtype)


def _launch(x2, r2, a_2, b_2, eps):
    """x2 (and optional r2): (rows, F). Returns (y2 or None, out2)."""
    rows, features = x2.shape
    fused = r2 is not None
    itemsize = x2.dtype.itemsize
    sub = _SUBLANE * max(1, 4 // itemsize)        # 8 (f32) / 16 (bf16) rows
    tile_budget, vmem_cap, min_steps = _hw_params()

    # Lane-dense folding: if F < 128 and divides 128, pack k = 128 // F logical
    # rows into each 128-wide lane vector so HBM loads and (most importantly)
    # stores are unmasked and no vreg lanes are wasted.
    k = _LANE // features if (features < _LANE and _LANE % features == 0) else 1
    L = k * features

    if k > 1:
        # Pad a handful of tail rows so rows % k == 0; keeping every store
        # lane-dense is far cheaper than a lane-sparse fallback on the whole
        # tensor.  (Padded tail rows produce out == b_2 and are sliced away.)
        pad = (-rows) % k
        if pad:
            x2 = jnp.pad(x2, ((0, pad), (0, 0)))
            if fused:
                r2 = jnp.pad(r2, ((0, pad), (0, 0)))
        n_rows = (rows + pad) // k
        xf = x2.reshape(n_rows, L)
        rf = r2.reshape(n_rows, L) if fused else None
    else:
        # No wrapper-side pad/slice: Pallas masks the ragged last row tile and
        # the lane dim equals the full array dim, so no extra HBM round trips.
        pad = 0
        n_rows = rows
        xf, rf = x2, r2

    # Parameters pre-cast to f32 and pre-tiled across the k folded segments.
    a_t = jnp.tile(jnp.asarray(a_2, jnp.float32).reshape(1, features), (1, k))
    b_t = jnp.tile(jnp.asarray(b_2, jnp.float32).reshape(1, features), (1, k))

    n_tiled = 4 if fused else 2                    # big row-tiled HBM operands
    lane_bytes = _round_up(L, _LANE) * itemsize    # VMEM pads lanes to 128
    tr = _pick_row_tile(n_rows, lane_bytes, n_tiled, sub, tile_budget, min_steps)
    grid = (pl.cdiv(n_rows, tr),)

    row_spec = pl.BlockSpec((tr, L), lambda i: (i, 0))
    par_spec = pl.BlockSpec((1, L), lambda i: (0, 0))

    in_arrays = [xf] + ([rf] if fused else []) + [a_t, b_t]
    in_specs = [row_spec] + ([row_spec] if fused else []) + [par_spec, par_spec]
    if k > 1:
        # Block-diagonal 0/1 matrix driving the MXU segment reduction.  Its
        # constant index_map means it is fetched once and stays VMEM-resident
        # across all grid steps.
        seg_id = jnp.arange(L, dtype=jnp.int32) // features
        seg = (seg_id[:, None] == seg_id[None, :]).astype(jnp.float32)
        in_arrays.append(seg)
        in_specs.append(pl.BlockSpec((L, L), lambda i: (0, 0)))

    if fused:
        kernel_fn = _add_ln_kernel_folded if k > 1 else _add_ln_kernel
        out_shape = (jax.ShapeDtypeStruct((n_rows, L), x2.dtype),
                     jax.ShapeDtypeStruct((n_rows, L), x2.dtype))
        out_specs = (row_spec, row_spec)
    else:
        kernel_fn = _ln_kernel_folded if k > 1 else _ln_kernel
        out_shape = jax.ShapeDtypeStruct((n_rows, L), x2.dtype)
        out_specs = row_spec

    kernel = functools.partial(kernel_fn, eps=eps, features=features)

    # Scoped VMEM sized from the actual working set (+ headroom), with a
    # per-generation cap so v7x (64 MiB physical) keeps compiler headroom.
    ws = 2 * n_tiled * _round_up(tr, sub) * lane_bytes      # double-buffered tiles
    ws += 2 * 2 * _SUBLANE * _round_up(L, _LANE) * 4        # resident params
    if k > 1:
        ws += 2 * _LANE * _LANE * 4                         # seg matrix
    vmem_limit = min(vmem_cap, ws + 16 * 1024 * 1024)

    out = pl.pallas_call(
        kernel,
        out_shape=out_shape,
        grid_spec=pltpu.PrefetchScalarGridSpec(
            num_scalar_prefetch=0,
            grid=grid,
            in_specs=in_specs,
            out_specs=out_specs,
        ),
        compiler_params=pltpu.CompilerParams(
            dimension_semantics=("parallel",),
            vmem_limit_bytes=vmem_limit,
        ),
    )(*in_arrays)

    def _unfold(o):
        if k == 1:
            return o
        o = o.reshape(n_rows * k, features)
        return o[:rows] if pad else o

    if fused:
        y2, o2 = out
        return _unfold(y2), _unfold(o2)
    return None, _unfold(out)


def layer_norm(x, a_2, b_2, eps=1e-6):
    """LayerNorm(x) with torch semantics (unbiased std, eps added to std)."""
    shape = x.shape
    x2 = x.reshape(-1, shape[-1])
    _, out2 = _launch(x2, None, a_2, b_2, eps)
    return out2.reshape(shape)


def add_layer_norm(x, residual, a_2, b_2, eps=1e-6):
    """Fused y = x + residual and LayerNorm(y). Returns (y, LayerNorm(y))."""
    shape = x.shape
    x2 = x.reshape(-1, shape[-1])
    r2 = residual.reshape(-1, shape[-1])
    y2, o2 = _launch(x2, r2, a_2, b_2, eps)
    return y2.reshape(shape), o2.reshape(shape)


def decoder_layer(x, self_attn, feed_forward, norm0_params, norm1_params, eps=1e-6):
    """DecoderLayer forward (eval mode; dropout == identity):
         x = x + self_attn(norm0(x), norm0(x), norm0(x))
         return x + feed_forward(norm1(x))
    self_attn / feed_forward are plain JAX callables (externally injected)."""
    a0, b0 = norm0_params
    a1, b1 = norm1_params
    h0 = layer_norm(x, a0, b0, eps)
    s0 = self_attn(h0, h0, h0)
    # Fused: the first residual add and the second sublayer's pre-norm share
    # one HBM pass of the activation.
    y, h1 = add_layer_norm(x, s0, a1, b1, eps)
    return y + feed_forward(h1)


if __name__ == "__main__":
    key = jax.random.PRNGKey(0)
    batch, seq, features = 2, 8, 32
    kx, kr = jax.random.split(key)

    x = jax.random.normal(kx, (batch, seq, features), dtype=jnp.float32)
    r = jax.random.normal(kr, (batch, seq, features), dtype=jnp.float32)

    # nn.Parameter(torch.ones(features)) / nn.Parameter(torch.zeros(features))
    a0 = jnp.ones((features,), dtype=jnp.float32)
    b0 = jnp.zeros((features,), dtype=jnp.float32)
    # give sublayer-1's norm non-trivial params so both parameter paths are hit
    a1 = 1.0 + 0.1 * jnp.arange(features, dtype=jnp.float32) / features
    b1 = 0.01 * jnp.arange(features, dtype=jnp.float32)
    eps = 1e-6

    def ln_ref(v, a, b):
        mean = jnp.mean(v, axis=-1, keepdims=True)
        std = jnp.sqrt(jnp.sum((v - mean) ** 2, axis=-1, keepdims=True)
                       / (features - 1))
        return a * (v - mean) / (std + eps) + b

    # 1) Standalone LayerNorm (the pre-norm inside each SublayerConnection).
    out = jax.block_until_ready(layer_norm(x, a0, b0, eps))
    assert out.shape == x.shape and out.dtype == x.dtype
    assert jnp.allclose(out, ln_ref(x, a0, b0), atol=5e-5, rtol=5e-5)

    # 2) Fused residual-add + pre-norm (the boundary between the two
    #    SublayerConnections: y = x + sublayer0_out, then sublayer1's norm).
    y, y_norm = add_layer_norm(x, r, a1, b1, eps)
    y = jax.block_until_ready(y)
    y_norm = jax.block_until_ready(y_norm)
    assert jnp.allclose(y, x + r, atol=1e-6, rtol=1e-6)
    assert jnp.allclose(y_norm, ln_ref(x + r, a1, b1), atol=5e-5, rtol=5e-5)

    # 3) Full DecoderLayer forward (eval mode) with simple stand-ins for the
    #    externally injected self-attention / feed-forward sublayers.
    self_attn = lambda q, k_, v: 0.5 * q + 0.25 * k_ + 0.125 * v
    feed_forward = lambda h: 0.5 * jnp.tanh(h)
    got = jax.block_until_ready(
        decoder_layer(x, self_attn, feed_forward, (a0, b0), (a1, b1), eps))

    h0 = ln_ref(x, a0, b0)
    y_ref = x + self_attn(h0, h0, h0)
    ref = y_ref + feed_forward(ln_ref(y_ref, a1, b1))
    assert got.shape == x.shape
    assert jnp.allclose(got, ref, atol=2e-4, rtol=2e-4)

    print("KERNEL_OK")
</pallas_src>

<mosaic_0001>
module attributes {stable_mosaic.version = 11 : i64} {
  func.func @_ln_kernel_folded(%arg0: i32, %arg1: memref<4x128xf32, #tpu.memory_space<vmem>>, %arg2: memref<1x128xf32, #tpu.memory_space<vmem>>, %arg3: memref<1x128xf32, #tpu.memory_space<vmem>>, %arg4: memref<128x128xf32, #tpu.memory_space<vmem>>, %arg5: memref<4x128xf32, #tpu.memory_space<vmem>>) attributes {dimension_semantics = [#tpu.dimension_semantics<parallel>], iteration_bounds = array<i64: 1>, scalar_prefetch = 0 : i64, scratch_operands = 0 : i64, tpu.core_type = #tpu.core_type<tc>, window_params = [{transform_indices = @transform_0, window_bounds = array<i64: 4, 128>}, {pipeline_mode = #tpu.pipeline_mode<synchronous>, transform_indices = @transform_1, window_bounds = array<i64: 1, 128>}, {pipeline_mode = #tpu.pipeline_mode<synchronous>, transform_indices = @transform_2, window_bounds = array<i64: 1, 128>}, {pipeline_mode = #tpu.pipeline_mode<synchronous>, transform_indices = @transform_3, window_bounds = array<i64: 128, 128>}, {transform_indices = @transform_4, window_bounds = array<i64: 4, 128>}]} {
    %c0 = arith.constant 0 : index
    %c0_0 = arith.constant 0 : index
    %0 = vector.load %arg1[%c0, %c0_0] : memref<4x128xf32, #tpu.memory_space<vmem>>, vector<4x128xf32>
    %c0_1 = arith.constant 0 : index
    %c0_2 = arith.constant 0 : index
    %1 = vector.load %arg2[%c0_1, %c0_2] : memref<1x128xf32, #tpu.memory_space<vmem>>, vector<1x128xf32>
    %c0_3 = arith.constant 0 : index
    %c0_4 = arith.constant 0 : index
    %2 = vector.load %arg3[%c0_3, %c0_4] : memref<1x128xf32, #tpu.memory_space<vmem>>, vector<1x128xf32>
    %c0_5 = arith.constant 0 : index
    %c0_6 = arith.constant 0 : index
    %3 = vector.load %arg4[%c0_5, %c0_6] : memref<128x128xf32, #tpu.memory_space<vmem>>, vector<128x128xf32>
    %4 = arith.truncf %0 : vector<4x128xf32> to vector<4x128xbf16>
    %5 = arith.extf %4 : vector<4x128xbf16> to vector<4x128xf32>
    %6 = arith.subf %0, %5 : vector<4x128xf32>
    %cst = arith.constant dense<0.000000e+00> : vector<4x128xf32>
    %7 = tpu.matmul %5, %3, %cst {dimension_numbers = #tpu.dot_dimension_numbers<[1], [0], [0], [1], [0, 0, 1, 1], [], []>} : vector<4x128xf32>, vector<128x128xf32>, vector<4x128xf32> -> vector<4x128xf32>
    %cst_7 = arith.constant dense<0.000000e+00> : vector<4x128xf32>
    %8 = tpu.matmul %6, %3, %cst_7 {dimension_numbers = #tpu.dot_dimension_numbers<[1], [0], [0], [1], [0, 0, 1, 1], [], []>} : vector<4x128xf32>, vector<128x128xf32>, vector<4x128xf32> -> vector<4x128xf32>
    %9 = arith.addf %7, %8 : vector<4x128xf32>
    %cst_8 = arith.constant 3.125000e-02 : f32
    %10 = vector.broadcast %cst_8 : f32 to vector<4x128xf32>
    %11 = arith.mulf %9, %10 : vector<4x128xf32>
    %12 = arith.subf %0, %11 : vector<4x128xf32>
    %13 = arith.mulf %12, %12 : vector<4x128xf32>
    %14 = arith.truncf %13 : vector<4x128xf32> to vector<4x128xbf16>
    %15 = arith.extf %14 : vector<4x128xbf16> to vector<4x128xf32>
    %16 = arith.subf %13, %15 : vector<4x128xf32>
    %cst_9 = arith.constant dense<0.000000e+00> : vector<4x128xf32>
    %17 = tpu.matmul %15, %3, %cst_9 {dimension_numbers = #tpu.dot_dimension_numbers<[1], [0], [0], [1], [0, 0, 1, 1], [], []>} : vector<4x128xf32>, vector<128x128xf32>, vector<4x128xf32> -> vector<4x128xf32>
    %cst_10 = arith.constant dense<0.000000e+00> : vector<4x128xf32>
    %18 = tpu.matmul %16, %3, %cst_10 {dimension_numbers = #tpu.dot_dimension_numbers<[1], [0], [0], [1], [0, 0, 1, 1], [], []>} : vector<4x128xf32>, vector<128x128xf32>, vector<4x128xf32> -> vector<4x128xf32>
    %19 = arith.addf %17, %18 : vector<4x128xf32>
    %cst_11 = arith.constant 0.0322580636 : f32
    %20 = vector.broadcast %cst_11 : f32 to vector<4x128xf32>
    %21 = arith.mulf %19, %20 : vector<4x128xf32>
    %22 = math.sqrt %21 : vector<4x128xf32>
    %cst_12 = arith.constant 9.99999997E-7 : f32
    %23 = vector.broadcast %cst_12 : f32 to vector<4x128xf32>
    %24 = arith.addf %22, %23 : vector<4x128xf32>
    %25 = tpu.reciprocal %24 {approx = true} : vector<4x128xf32> -> vector<4x128xf32>
    %26 = arith.mulf %24, %25 : vector<4x128xf32>
    %cst_13 = arith.constant 2.000000e+00 : f32
    %27 = vector.broadcast %cst_13 : f32 to vector<4x128xf32>
    %28 = arith.subf %27, %26 : vector<4x128xf32>
    %29 = arith.mulf %25, %28 : vector<4x128xf32>
    %30 = vector.broadcast %1 : vector<1x128xf32> to vector<4x128xf32>
    %31 = arith.mulf %30, %29 : vector<4x128xf32>
    %32 = arith.mulf %31, %12 : vector<4x128xf32>
    %33 = vector.broadcast %2 : vector<1x128xf32> to vector<4x128xf32>
    %34 = arith.addf %32, %33 : vector<4x128xf32>
    %c0_14 = arith.constant 0 : index
    %c0_15 = arith.constant 0 : index
    %35 = vector.load %arg5[%c0_14, %c0_15] : memref<4x128xf32, #tpu.memory_space<vmem>>, vector<4x128xf32>
    tpu.vector_store %arg5[%c0_14, %c0_15], %34 {strides = array<i32>} : memref<4x128xf32, #tpu.memory_space<vmem>>, vector<4x128xf32>,
    return
  }
  func.func @transform_0(%arg0: i32) -> (i32, i32) {
    %c0_i32 = arith.constant 0 : i32
    %c0_i32_0 = arith.constant 0 : i32
    return %arg0, %c0_i32 : i32, i32
  }
  func.func @transform_1(%arg0: i32) -> (i32, i32) {
    %c0_i32 = arith.constant 0 : i32
    %c0_i32_0 = arith.constant 0 : i32
    %c0_i32_1 = arith.constant 0 : i32
    return %c0_i32, %c0_i32_0 : i32, i32
  }
  func.func @transform_2(%arg0: i32) -> (i32, i32) {
    %c0_i32 = arith.constant 0 : i32
    %c0_i32_0 = arith.constant 0 : i32
    %c0_i32_1 = arith.constant 0 : i32
    return %c0_i32, %c0_i32_0 : i32, i32
  }
  func.func @transform_3(%arg0: i32) -> (i32, i32) {
    %c0_i32 = arith.constant 0 : i32
    %c0_i32_0 = arith.constant 0 : i32
    %c0_i32_1 = arith.constant 0 : i32
    return %c0_i32, %c0_i32_0 : i32, i32
  }
  func.func @transform_4(%arg0: i32) -> (i32, i32) {
    %c0_i32 = arith.constant 0 : i32
    %c0_i32_0 = arith.constant 0 : i32
    return %arg0, %c0_i32 : i32, i32
  }
}

</mosaic_0001>

<bundles_post_ra>
// kernel: tpu_custom_call.1
= control target key start
LH: loop header
LB: loop body
LE: loop exit
PB: predicated region body
PF: predicated region fallthrough
CT: control target
= control target key end

     0   :  { %9 = vsyncpa [#allocation3], 0  ;;  %s949_s0 = inlined_call_operand.hbm [shape: f32[4,128], index: 0, kind: input, shape index: {}]   ;;  %s950_s1 = inlined_call_operand.vmem [shape: f32[1,128], index: 1, kind: input, shape index: {}]   ;;  %s951_s2 = inlined_call_operand.vmem [shape: f32[1,128], index: 2, kind: input, shape index: {}]   ;;  %s952_s3 = inlined_call_operand.hbm [shape: f32[128,128], index: 3, kind: input, shape index: {}]   ;;  %s953_s4 = inlined_call_operand.hbm [shape: f32[4,128], index: 4, kind: output, shape index: {}]  }
   0x1   :  { %10 = vsyncpa [#allocation6], 0 }
   0x2   :  { %11 = vsyncpa [#allocation4], 0  ;;  %s791_s15 = smov [#allocation2]   ;;  %s792_s17 = smov [#allocation5]  }
   0x3   :  { %s18_s16 = sshll.u32 %s791_s15, 4  ;;  %s31_s18 = sshll.u32 %s792_s17, 4  ;;  %s19_s16 = int_to_ptr.vmem [resolvable:$true] %s18_s16  ;;  %s824_s18 = int_to_ptr.vmem [resolvable:$true] %s31_s18 }
   0x4   :  { %s719_s21 = scalar_lea.hbm %s949_s0, 64 }
   0x5   :  { %p720_p0 = scmp.ne.s32.totalorder %s949_s0, %s719_s21  ;;  %p723_p1 = scmp.lt.u32.totalorder %s719_s21, %s949_s0 }
   0x7   :  { %p725_p2 = pnand %p723_p1, %p720_p0 }
   0x9   :  { %728 = shalt.err (!%p725_p2)
}
   0xa   :  { %s729_s26 = scalar_lea.vmem %s19_s16, 64  ;;  %p734_p4 = scmp.lt.s32.totalorder %s19_s16, %s19_s16 }
   0xb   :  { %p730_p3 = scmp.ne.s32.totalorder %s19_s16, %s729_s26  ;;  %p735_p5 = scmp.lt.s32.totalorder %s729_s26, %s729_s26 }
   0xd   :  { %p736_p6 = por %p735_p5, %p734_p4 }
   0xf   :  { %p737_p7 = pnand %p736_p6, %p730_p3 }
  0x11   :  { %740 = shalt.err (!%p737_p7)
}
  0x12   :  { %21 = dma.hbm_to_vmem [thread:$0]  %s949_s0, 64, %s19_s16, [#allocation3]  }
  0x13   :  { %s741_s5 = scalar_lea.hbm %s952_s3, 2048 }
  0x14   :  { %p742_p8 = scmp.ne.s32.totalorder %s952_s3, %s741_s5  ;;  %p745_p9 = scmp.lt.u32.totalorder %s741_s5, %s952_s3 }
  0x16   :  { %p747_p10 = pnand %p745_p9, %p742_p8 }
  0x18   :  { %750 = shalt.err (!%p747_p10)
}
  0x19   :  { %s751_s10 = scalar_lea.vmem %s824_s18, 2048  ;;  %p756_p12 = scmp.lt.s32.totalorder %s824_s18, %s824_s18 }
  0x1a   :  { %p752_p11 = scmp.ne.s32.totalorder %s824_s18, %s751_s10  ;;  %p757_p13 = scmp.lt.s32.totalorder %s751_s10, %s751_s10 }
  0x1c   :  { %p758_p0 = por %p757_p13, %p756_p12 }
  0x1e   :  { %p759_p1 = pnand %p758_p0, %p752_p11 }
  0x20   :  { %762 = shalt.err (!%p759_p1)
}
  0x21   :  { %s793_s0 = smov 128   ;;  %s794_s11 = smov 8  }
  0x22   :  { %37 = dma.hbm_to_vmem [thread:$0]  %s952_s3, 2048, %s824_s18, [#allocation6], %s793_s0, %s793_s0, %s794_s11  }
  0x23   :  { %785 = dma.done.wait [#allocation3], 64  }
  0x24   :  { %786 = vsyncadd [#allocation3], 4294967232 }
  0x25   :  { %787 = dma.done.wait [#allocation6], 2048  }
  0x26   :  { %788 = vsyncadd [#allocation6], 4294965248  ;;  %v795_v0 = vmov 0.0|0.0   ;;  %vm796_vm0 = vmmov 0   ;;  %v797_v1 = vmov 0.0   ;;  %v47_v2 = vld [vmem:[#allocation5] sm:$0xff] }
  0x27   :  { %607 = vmatprep.subr.bf16.mxu0 %v795_v0  ;;  %499 = vmatprep.mubr.msk.f32.mxu0 %vm796_vm0, %v797_v1  ;;  %v48_v3 = vld [vmem:[#allocation5 + $0x8] sm:$0xff]  ;;  %v49_v4 = vld [vmem:[#allocation5 + $0x10] sm:$0xff]  ;;  %v50_v6 = vld [vmem:[#allocation5 + $0x18] sm:$0xff]  ;;  %s798_s17 = smov [#allocation7]  }
  0x28   :  { %655 = vmatprep.subr.bf16.mxu1 %v795_v0  ;;  %569 = vmatprep.mubr.msk.f32.mxu1 %vm796_vm0, %v797_v1  ;;  %v861_v5 = vpack.c.bf16 %v48_v3, %v47_v2  ;;  %v864_v7 = vpack.c.bf16 %v50_v6, %v49_v4  ;;  %v51_v8 = vld [vmem:[#allocation5 + $0x20] sm:$0xff]  ;;  %v52_v9 = vld [vmem:[#allocation5 + $0x28] sm:$0xff]  ;;  %v53_v11 = vld [vmem:[#allocation5 + $0x30] sm:$0xff]  ;;  %s387_s18 = sshll.u32 %s798_s17, 4  ;;  %s388_s18 = int_to_ptr.vmem [resolvable:$true] %s387_s18 }
  0x29   :  { %v870_v10 = vpack.c.bf16 %v52_v9, %v51_v8  ;;  %v54_v12 = vld [vmem:[#allocation5 + $0x38] sm:$0xff]  ;;  %v55_v14 = vld [vmem:[#allocation5 + $0x40] sm:$0xff]  ;;  %v56_v15 = vld [vmem:[#allocation5 + $0x48] sm:$0xff]  ;;  %s763_s19 = scalar_lea.vmem %s388_s18, 64  ;;  %p768_p3 = scmp.lt.s32.totalorder %s388_s18, %s388_s18 }
  0x2a   :  { %609 = vmatpush3.bf16.msra.mxu0 %v861_v5  ;;  %657 = vmatpush3.bf16.msra.mxu1 %v861_v5  ;;  %v876_v13 = vpack.c.bf16 %v54_v12, %v53_v11  ;;  %v882_v16 = vpack.c.bf16 %v56_v15, %v55_v14  ;;  %v57_v17 = vld [vmem:[#allocation5 + $0x50] sm:$0xff]  ;;  %v58_v18 = vld [vmem:[#allocation5 + $0x58] sm:$0xff]  ;;  %v59_v21 = vld [vmem:[#allocation5 + $0x60] sm:$0xff]  ;;  %p764_p2 = scmp.ne.s32.totalorder %s388_s18, %s763_s19  ;;  %p769_p4 = scmp.lt.s32.totalorder %s763_s19, %s763_s19 }
  0x2b   :  { %610 = vmatprep.subr.bf16.mxu0 %v795_v0  ;;  %658 = vmatprep.subr.bf16.mxu1 %v795_v0  ;;  %v888_v19 = vpack.c.bf16 %v58_v18, %v57_v17  ;;  %v44_v20 = vld [vmem:[#allocation2] sm:$0xf]  ;;  %v60_v22 = vld [vmem:[#allocation5 + $0x68] sm:$0xff]  ;;  %v61_v25 = vld [vmem:[#allocation5 + $0x70] sm:$0xff] }
  0x2c   :  { %v63_v23 = vpack.c.bf16 %v44_v20, %v44_v20  ;;  %v626_v24 = vpack.c.bf16 %v60_v22, %v59_v21  ;;  %v62_v26 = vld [vmem:[#allocation5 + $0x78] sm:$0xff]  ;;  %p770_p5 = por %p769_p4, %p768_p3 }
  0x2d   :  { %v629_v28 = vpack.c.bf16 %v62_v26, %v61_v25  ;;  %v397_v50 = vld [vmem:[%s950_s1] ss:$0 sm:$0xff] }
  0x2e   :  { %612 = vmatpush3.bf16.msra.mxu0 %v864_v7  ;;  %660 = vmatpush3.bf16.msra.mxu1 %v864_v7  ;;  %v64_v27 = vunpack.c.l.bf16 %v63_v23  ;;  %v398_v53 = vld [vmem:[%s951_s2] ss:$0 sm:$0xff]  ;;  %p771_p6 = pnand %p770_p5, %p764_p2 }
  0x2f   :  { %613 = vmatprep.subr.bf16.mxu0 %v795_v0  ;;  %661 = vmatprep.subr.bf16.mxu1 %v795_v0 }
  0x30   :  { %v65_v29 = vsub.f32 %v44_v20, %v64_v27 }
  0x32   :  { %615 = vmatpush3.bf16.msra.mxu0 %v870_v10  ;;  %663 = vmatpush3.bf16.msra.mxu1 %v870_v10 }
  0x33   :  { %616 = vmatprep.subr.bf16.mxu0 %v795_v0  ;;  %664 = vmatprep.subr.bf16.mxu1 %v795_v0 }
  0x36   :  { %618 = vmatpush3.bf16.msra.mxu0 %v876_v13  ;;  %666 = vmatpush3.bf16.msra.mxu1 %v876_v13 }
  0x37   :  { %619 = vmatprep.subr.bf16.mxu0 %v795_v0  ;;  %667 = vmatprep.subr.bf16.mxu1 %v795_v0 }
  0x3a   :  { %621 = vmatpush3.bf16.msra.mxu0 %v882_v16  ;;  %669 = vmatpush3.bf16.msra.mxu1 %v882_v16 }
  0x3b   :  { %622 = vmatprep.subr.bf16.mxu0 %v795_v0  ;;  %670 = vmatprep.subr.bf16.mxu1 %v795_v0 }
  0x3e   :  { %624 = vmatpush3.bf16.msra.mxu0 %v888_v19  ;;  %672 = vmatpush3.bf16.msra.mxu1 %v888_v19 }
  0x3f   :  { %625 = vmatprep.subr.bf16.mxu0 %v795_v0  ;;  %673 = vmatprep.subr.bf16.mxu1 %v795_v0 }
  0x42   :  { %627 = vmatpush3.bf16.msra.mxu0 %v626_v24  ;;  %675 = vmatpush3.bf16.msra.mxu1 %v626_v24 }
  0x43   :  { %628 = vmatprep.subr.bf16.mxu0 %v795_v0  ;;  %676 = vmatprep.subr.bf16.mxu1 %v795_v0 }
  0x46   :  { %630 = vmatpush3.bf16.msra.mxu0 %v629_v28  ;;  %678 = vmatpush3.bf16.msra.mxu1 %v629_v28 }
  0x47   :  { %631 = vmatprep.subr.bf16.mxu0 %v795_v0  ;;  %679 = vmatprep.subr.bf16.mxu1 %v795_v0 }
  0x49   :  { %500 = vmatmul.mubr.f32.vlgmr.msra.gmra.mrb[0].mxu0 %v65_v29 }
  0x4a   :  { %633 = vmatpush3.bf16.msra.mxu0 %v861_v5  ;;  %534 = vmatprep.mubr.msk.f32.mxu0 %vm796_vm0, %v797_v1 }
  0x4b   :  { %634 = vmatprep.subr.bf16.mxu0 %v795_v0 }
  0x4e   :  { %636 = vmatpush3.bf16.msra.mxu0 %v864_v7 }
  0x4f   :  { %637 = vmatprep.subr.bf16.mxu0 %v795_v0 }
  0x52   :  { %639 = vmatpush3.bf16.msra.mxu0 %v870_v10 }
  0x53   :  { %640 = vmatprep.subr.bf16.mxu0 %v795_v0 }
  0x56   :  { %642 = vmatpush3.bf16.msra.mxu0 %v876_v13 }
  0x57   :  { %643 = vmatprep.subr.bf16.mxu0 %v795_v0 }
  0x5a   :  { %645 = vmatpush3.bf16.msra.mxu0 %v882_v16 }
  0x5b   :  { %646 = vmatprep.subr.bf16.mxu0 %v795_v0 }
  0x5e   :  { %648 = vmatpush3.bf16.msra.mxu0 %v888_v19 }
  0x5f   :  { %649 = vmatprep.subr.bf16.mxu0 %v795_v0 }
  0x62   :  { %651 = vmatpush3.bf16.msra.mxu0 %v626_v24 }
  0x63   :  { %652 = vmatprep.subr.bf16.mxu0 %v795_v0 }
  0x66   :  { %654 = vmatpush3.bf16.msra.mxu0 %v629_v28 }
  0x69   :  { %535 = vmatmul.mubr.f32.vlgmr.msra.gmra.mrb[0].mxu0 %v64_v27 }
 0x13c   :  { %v202_v30 = vpop.f32.mrb[0].mxu0 }
 0x13d   :  { %v206_v31 = vmul.f32 0.03125, %v202_v30  ;;  %v536_v32 = vpop.f32.mrb[1].mxu0 }
 0x13f   :  { %v207_v33 = vsub.f32 %v44_v20, %v206_v31 }
 0x141   :  { %v208_v34 = vmul.f32 %v207_v33, %v207_v33 }
 0x143   :  { %v209_v35 = vpack.c.bf16 %v208_v34, %v208_v34 }
 0x145   :  { %v210_v36 = vunpack.c.l.bf16 %v209_v35 }
 0x147   :  { %v211_v37 = vsub.f32 %v208_v34, %v210_v36 }
 0x149   :  { %570 = vmatmul.mubr.f32.vlgmr.msra.gmra.mrb[0].mxu1 %v211_v37 }
 0x14a   :  { %681 = vmatpush3.bf16.msra.mxu1 %v861_v5  ;;  %604 = vmatprep.mubr.msk.f32.mxu1 %vm796_vm0, %v797_v1 }
 0x14b   :  { %682 = vmatprep.subr.bf16.mxu1 %v795_v0 }
 0x14e   :  { %684 = vmatpush3.bf16.msra.mxu1 %v864_v7 }
 0x14f   :  { %685 = vmatprep.subr.bf16.mxu1 %v795_v0 }
 0x152   :  { %687 = vmatpush3.bf16.msra.mxu1 %v870_v10 }
 0x153   :  { %688 = vmatprep.subr.bf16.mxu1 %v795_v0 }
 0x156   :  { %690 = vmatpush3.bf16.msra.mxu1 %v876_v13 }
 0x157   :  { %691 = vmatprep.subr.bf16.mxu1 %v795_v0 }
 0x15a   :  { %693 = vmatpush3.bf16.msra.mxu1 %v882_v16 }
 0x15b   :  { %694 = vmatprep.subr.bf16.mxu1 %v795_v0 }
 0x15e   :  { %696 = vmatpush3.bf16.msra.mxu1 %v888_v19 }
 0x15f   :  { %697 = vmatprep.subr.bf16.mxu1 %v795_v0 }
 0x162   :  { %699 = vmatpush3.bf16.msra.mxu1 %v626_v24 }
 0x163   :  { %700 = vmatprep.subr.bf16.mxu1 %v795_v0 }
 0x166   :  { %702 = vmatpush3.bf16.msra.mxu1 %v629_v28 }
 0x169   :  { %605 = vmatmul.mubr.f32.vlgmr.msra.gmra.mrb[0].mxu1 %v210_v36 }
 0x23c   :  { %v348_v38 = vpop.f32.mrb[0].mxu1 }
 0x23d   :  { %v352_v39 = vmul.f32 0.032258064, %v348_v38  ;;  %v606_v40 = vpop.f32.mrb[1].mxu1 }
 0x23f   :  { %715 = vrsqrt.f32 %v352_v39  ;;  %vm355_vm1 = vcmp.eq.f32.partialorder %v352_v39, inf  ;;  %v358_v43 = vand.u32 2147483648, %v352_v39  ;;  %vm357_vm2 = vcmp.eq.f32.partialorder %v352_v39, 0.0 }
 0x249   :  { %v716_v41 = vpop.eup %715 }
 0x24a   :  { %v354_v42 = vmul.f32 %v716_v41, %v352_v39 }
 0x24c   :  { %v356_v44 = vsel %vm355_vm1, %v352_v39, %v354_v42 }
 0x24d   :  { %v359_v45 = vsel %vm357_vm2, %v358_v43, %v356_v44 }
 0x24e   :  { %v360_v46 = vadd.f32 1e-06, %v359_v45 }
 0x250   :  { %717 = vrcp.f32 %v360_v46 }
 0x25a   :  { %v718_v47 = vpop.eup %717 }
 0x25b   :  { %v362_v48 = vmul.f32 %v718_v47, %v360_v46 }
 0x25d   :  { %v363_v49 = vsub.f32 2.0, %v362_v48 }
 0x25f   :  { %v364_v51 = vmul.f32 %v718_v47, %v363_v49 }
 0x261   :  { %v371_v52 = vmul.f32 %v397_v50, %v364_v51 }
 0x263   :  { %v372_v54 = vmul.f32 %v371_v52, %v207_v33 }
 0x265   :  { %v379_v55 = vadd.f32 %v398_v53, %v372_v54 }
 0x267   :  { %380 = vst [vmem:[#allocation7] sm:$0xf] %v379_v55 }
 0x268   :  { %774 = shalt.err (!%p771_p6)
}
 0x269   :  { %s775_s21 = scalar_lea.hbm %s953_s4, 64 }
 0x26a   :  { %p776_p7 = scmp.ne.s32.totalorder %s953_s4, %s775_s21  ;;  %p779_p8 = scmp.lt.u32.totalorder %s775_s21, %s953_s4 }
 0x26c   :  { %p781_p9 = pnand %p779_p8, %p776_p7 }
 0x26e   :  { %784 = shalt.err (!%p781_p9)
}
 0x26f   :  { %390 = dma.vmem_to_hbm [thread:$0]  %s388_s18, 64, %s953_s4, [#allocation4]  }
 0x270   :  { %789 = dma.done.wait [#allocation4], 64  }
 0x271   :  { %790 = vsyncadd [#allocation4], 4294967232 }
 0x272   :  { %394 = vsyncpa [#allocation3], 1 }
 0x273   :  { %395 = vsyncpa [#allocation6], 1 }
 0x274   :  { %396 = vsyncpa [#allocation4], 1 }

</bundles_post_ra>
